<compile_context>
chip_gen: v6e
topology: v6e:2x2x1
jax: 0.10.0
libtpu: 0.0.40
codegen_flags: <defaults>
</compile_context>

<pallas_src>
import jax
import jax.numpy as jnp
from jax.experimental import pallas as pl
from jax.experimental.pallas import tpu as pltpu

_MIB = 1024 * 1024


# --------------------------------------------------------------------------
# Kernel body
# --------------------------------------------------------------------------
def _quick_gelu_kernel(x_ref, o_ref):
    # y = x * sigmoid(1.702 * x) = x / (1 + exp(-1.702 * x))
    # Compute in f32 (kernel is HBM-bound, so the upcast is free).
    xf = x_ref[...].astype(jnp.float32)
    t = jnp.exp(-1.702 * xf)                       # EUP slot
    y = xf * pl.reciprocal(1.0 + t, approx=True)   # EUP recip, no VALU NR step
    o_ref[...] = y.astype(o_ref.dtype)


# --------------------------------------------------------------------------
# Sizing helpers
# --------------------------------------------------------------------------
def _round_up(a: int, m: int) -> int:
    return (a + m - 1) // m * m


def _native_sublane(dtype) -> int:
    # Dtype-native sublane packing: f32 -> 8, bf16/f16 -> 16, int8/fp8 -> 32.
    return {4: 8, 2: 16, 1: 32}.get(jnp.dtype(dtype).itemsize, 8)


def _tpu_block_budget():
    """Return (target_block_bytes, vmem_limit_bytes) per TPU generation."""
    try:
        vmem_cap = int(pltpu.get_tpu_info().vmem_capacity_bytes)
    except Exception:
        vmem_cap = 128 * _MIB  # conservative default (v5e/v6e-like)

    if vmem_cap <= 64 * _MIB:
        # v7x-class: ~3.2 TB/s HBM, 64 MiB VMEM per TC -> bigger steps so the
        # fixed ~0.35 us/grid-step overhead stays <5% of the DMA time.
        target = 6 * _MIB
    else:
        # v5e/v6e: ~0.8-1.4 TB/s HBM -> 2 MiB blocks already hit ~85% of the
        # HBM roofline; larger tiles only add VMEM pressure.
        target = 2 * _MIB

    # in + out double-buffered (~4x block) plus f32 temps / Mosaic scratch,
    # capped with headroom below the physical (or reported) VMEM capacity.
    vmem_limit = min(max(32 * _MIB, 6 * target), vmem_cap - 8 * _MIB)
    vmem_limit = max(vmem_limit, 16 * _MIB)
    return target, int(vmem_limit)


# --------------------------------------------------------------------------
# pallas_call wrappers
# --------------------------------------------------------------------------
def _quick_gelu_2d(x2d, target_block_bytes: int, vmem_limit: int):
    """Lane-dense tiled path: x2d is (rows, cols) with cols % 128 == 0."""
    rows, cols = x2d.shape
    itemsize = jnp.dtype(x2d.dtype).itemsize
    sublane = _native_sublane(x2d.dtype)
    padded_cols = _round_up(cols, 128)         # == cols on this path
    bytes_per_row = padded_cols * itemsize     # lane-padded VMEM accounting

    tm = (target_block_bytes // bytes_per_row) // sublane * sublane
    tm = max(tm, sublane)
    if tm >= rows:
        half = rows // 2
        if half >= sublane and half % sublane == 0:
            # Two equal, sublane-aligned blocks -> even load on 2 TCs (v7x).
            tm = half
        elif rows > 2 * sublane:
            tm = _round_up(pl.cdiv(rows, 2), sublane)
        else:
            tm = rows                          # single whole-array block
    grid = (pl.cdiv(rows, tm),)                # ragged last block is masked

    return pl.pallas_call(
        _quick_gelu_kernel,
        out_shape=jax.ShapeDtypeStruct((rows, cols), x2d.dtype),
        grid_spec=pltpu.PrefetchScalarGridSpec(
            num_scalar_prefetch=0,
            grid=grid,
            in_specs=[pl.BlockSpec((tm, cols), lambda i: (i, 0))],
            out_specs=pl.BlockSpec((tm, cols), lambda i: (i, 0)),
        ),
        compiler_params=pltpu.CompilerParams(
            # "parallel" lets Mosaic shard the row axis across TensorCores on
            # multi-TC parts; it is a measured no-op on single-TC v5e/v6e.
            # If a v7x trace shows only one TC active, switch this axis to
            # pltpu.CORE_PARALLEL.
            dimension_semantics=("parallel",),
            vmem_limit_bytes=vmem_limit,
        ),
    )(x2d)


def _quick_gelu_whole(x2d, vmem_limit: int):
    """Single whole-array block (used for <128-element tails / tiny inputs)."""
    return pl.pallas_call(
        _quick_gelu_kernel,
        out_shape=jax.ShapeDtypeStruct(x2d.shape, x2d.dtype),
        compiler_params=pltpu.CompilerParams(vmem_limit_bytes=vmem_limit),
    )(x2d)


def quick_gelu(x: jnp.ndarray) -> jnp.ndarray:
    """Elementwise QuickGELU: x * sigmoid(1.702 * x)."""
    orig_shape = x.shape
    n = x.size
    if n == 0:
        return x

    target, vmem_limit = _tpu_block_budget()
    x_flat = x.reshape(-1)
    n_main = (n // 128) * 128

    if n_main == n:
        # Lane-dense zero-copy path (all standard NN activation shapes).
        cols = next(w for w in (1024, 512, 256, 128) if n % w == 0)
        y = _quick_gelu_2d(x_flat.reshape(n // cols, cols), target, vmem_limit)
        return y.reshape(orig_shape)

    if n_main == 0:
        # Entire tensor has < 128 elements: one tiny single-block call.
        y = _quick_gelu_whole(x_flat.reshape(1, n), vmem_limit)
        return y.reshape(orig_shape)

    # Ragged total size: peel. >99% of elements go through the lane-dense
    # path with full-width stores; the <128-element tail runs as one tiny
    # block. (The concatenate costs one extra pass at the XLA level, but only
    # for sizes not divisible by 128.)
    cols = next(w for w in (1024, 512, 256, 128) if n_main % w == 0)
    y_main = _quick_gelu_2d(x_flat[:n_main].reshape(n_main // cols, cols),
                            target, vmem_limit)
    y_tail = _quick_gelu_whole(x_flat[n_main:].reshape(1, n - n_main),
                               vmem_limit)
    y_flat = jnp.concatenate([y_main.reshape(-1), y_tail.reshape(-1)])
    return y_flat.reshape(orig_shape)


def quick_gelu_ref(x: jnp.ndarray) -> jnp.ndarray:
    return x * jax.nn.sigmoid(1.702 * x)


# --------------------------------------------------------------------------
# Self-test
# --------------------------------------------------------------------------
if __name__ == "__main__":
    key = jax.random.PRNGKey(0)

    # Small transformer-ish activation: (batch=2, seq=8, hidden=32).
    x = jax.random.normal(key, (2, 8, 32), dtype=jnp.float32)
    y = quick_gelu(x)
    jax.block_until_ready(y)
    assert y.shape == x.shape and y.dtype == x.dtype
    assert jnp.allclose(y, quick_gelu_ref(x), atol=3e-2, rtol=3e-2)

    # Exercise: lane-dense single-block, ragged peel path, multi-block path.
    for shape in [(2, 4, 16, 16), (5, 7, 13), (4, 96, 1024)]:
        key, sub = jax.random.split(key)
        xi = jax.random.normal(sub, shape, dtype=jnp.float32)
        yi = quick_gelu(xi)
        jax.block_until_ready(yi)
        assert yi.shape == xi.shape and yi.dtype == xi.dtype
        assert jnp.allclose(yi, quick_gelu_ref(xi), atol=3e-2, rtol=3e-2), shape

    # bf16: exercises the sublane=16 rounding and the even two-block split.
    key, sub = jax.random.split(key)
    xb = jax.random.normal(sub, (4, 128, 256), dtype=jnp.float32).astype(jnp.bfloat16)
    yb = quick_gelu(xb)
    jax.block_until_ready(yb)
    rb = quick_gelu_ref(xb.astype(jnp.float32)).astype(jnp.bfloat16)
    assert yb.shape == xb.shape and yb.dtype == xb.dtype
    assert jnp.allclose(yb.astype(jnp.float32), rb.astype(jnp.float32),
                        atol=5e-2, rtol=5e-2)

    print("KERNEL_OK")
</pallas_src>

<mosaic_0001>
module attributes {stable_mosaic.version = 11 : i64} {
  func.func @_quick_gelu_kernel(%arg0: i32, %arg1: memref<1x512xf32, #tpu.memory_space<vmem>>, %arg2: memref<1x512xf32, #tpu.memory_space<vmem>>) attributes {dimension_semantics = [#tpu.dimension_semantics<parallel>], iteration_bounds = array<i64: 1>, scalar_prefetch = 0 : i64, scratch_operands = 0 : i64, tpu.core_type = #tpu.core_type<tc>, window_params = [{transform_indices = @transform_0, window_bounds = array<i64: 1, 512>}, {transform_indices = @transform_1, window_bounds = array<i64: 1, 512>}]} {
    %c0 = arith.constant 0 : index
    %c0_0 = arith.constant 0 : index
    %0 = vector.load %arg1[%c0, %c0_0] : memref<1x512xf32, #tpu.memory_space<vmem>>, vector<1x512xf32>
    %cst = arith.constant -1.702000e+00 : f32
    %1 = vector.broadcast %cst : f32 to vector<1x512xf32>
    %2 = arith.mulf %1, %0 : vector<1x512xf32>
    %3 = math.exp %2 : vector<1x512xf32>
    %cst_1 = arith.constant 1.000000e+00 : f32
    %4 = vector.broadcast %cst_1 : f32 to vector<1x512xf32>
    %5 = arith.addf %4, %3 : vector<1x512xf32>
    %6 = tpu.reciprocal %5 {approx = true} : vector<1x512xf32> -> vector<1x512xf32>
    %7 = arith.mulf %0, %6 : vector<1x512xf32>
    %c0_2 = arith.constant 0 : index
    %c0_3 = arith.constant 0 : index
    %8 = vector.load %arg2[%c0_2, %c0_3] : memref<1x512xf32, #tpu.memory_space<vmem>>, vector<1x512xf32>
    tpu.vector_store %arg2[%c0_2, %c0_3], %7 {strides = array<i32>} : memref<1x512xf32, #tpu.memory_space<vmem>>, vector<1x512xf32>,
    return
  }
  func.func @transform_0(%arg0: i32) -> (i32, i32) {
    %c0_i32 = arith.constant 0 : i32
    %c0_i32_0 = arith.constant 0 : i32
    return %arg0, %c0_i32 : i32, i32
  }
  func.func @transform_1(%arg0: i32) -> (i32, i32) {
    %c0_i32 = arith.constant 0 : i32
    %c0_i32_0 = arith.constant 0 : i32
    return %arg0, %c0_i32 : i32, i32
  }
}

</mosaic_0001>

<bundles_post_ra>
// kernel: tpu_custom_call.1
= control target key start
LH: loop header
LB: loop body
LE: loop exit
PB: predicated region body
PF: predicated region fallthrough
CT: control target
= control target key end

     0   :  { %6 = vsyncpa [#allocation3], 0  ;;  %s116_s0 = inlined_call_operand.hbm [shape: f32[1,512], index: 0, kind: input, shape index: {}]   ;;  %s117_s1 = inlined_call_operand.hbm [shape: f32[1,512], index: 1, kind: output, shape index: {}]  }
   0x1   :  { %7 = vsyncpa [#allocation4], 0  ;;  %s98_s6 = smov [#allocation2]  }
   0x2   :  { %s14_s7 = sshll.u32 %s98_s6, 4  ;;  %s15_s7 = int_to_ptr.vmem [resolvable:$true] %s14_s7 }
   0x3   :  { %s62_s8 = scalar_lea.vmem %s15_s7, 64  ;;  %p67_p1 = scmp.lt.s32.totalorder %s15_s7, %s15_s7 }
   0x4   :  { %p63_p0 = scmp.ne.s32.totalorder %s15_s7, %s62_s8  ;;  %p68_p2 = scmp.lt.s32.totalorder %s62_s8, %s62_s8 }
   0x6   :  { %p69_p3 = por %p68_p2, %p67_p1 }
   0x8   :  { %p70_p4 = pnand %p69_p3, %p63_p0 }
   0xa   :  { %73 = shalt.err (!%p70_p4)
}
   0xb   :  { %17 = dma.hbm_to_vmem [thread:$0]  %s116_s0, 64, %s15_s7, [#allocation3]  }
   0xc   :  { %94 = dma.done.wait [#allocation3], 64  }
   0xd   :  { %95 = vsyncadd [#allocation3], 4294967232  ;;  %v21_v0 = vld [vmem:[#allocation2] sm:$0xf]  ;;  %v28_v5 = vlaneseq  ;;  %s99_s11 = smov [#allocation5]  }
   0xe   :  { %v22_v1 = vmul.f32 -1.702, %v21_v0  ;;  %s39_s12 = sshll.u32 %s99_s11, 4  ;;  %s40_s12 = int_to_ptr.vmem [resolvable:$true] %s39_s12 }
   0xf   :  { %vm30_vm0 = vcmp.lt.s32.totalorder %v28_v5, 512  ;;  %s74_s13 = scalar_lea.vmem %s40_s12, 64  ;;  %p79_p6 = scmp.lt.s32.totalorder %s40_s12, %s40_s12 }
  0x10   :  { %v23_v2 = vmul.f32 1.442695, %v22_v1  ;;  %p75_p5 = scmp.ne.s32.totalorder %s40_s12, %s74_s13  ;;  %p80_p7 = scmp.lt.s32.totalorder %s74_s13, %s74_s13 }
  0x12   :  { %50 = vpow2.f32 %v23_v2  ;;  %p81_p8 = por %p80_p7, %p79_p6 }
  0x14   :  { %p82_p9 = pnand %p81_p8, %p75_p5 }
  0x1f   :  { %v51_v3 = vpop.eup %50 }
  0x20   :  { %v25_v4 = vadd.f32 1.0, %v51_v3 }
  0x22   :  { %52 = vrcp.f32 %v25_v4 }
  0x2f   :  { %v53_v6 = vpop.eup %52 }
  0x30   :  { %v27_v7 = vmul.f32 %v53_v6, %v21_v0 }
  0x32   :  { %32 = vst.msk [vmem:[#allocation5] sm:$0xf] %vm30_vm0, %v27_v7 }
  0x33   :  { %85 = shalt.err (!%p82_p9)
}
  0x34   :  { %42 = dma.vmem_to_hbm [thread:$0]  %s40_s12, 64, %s117_s1, [#allocation4]  }
  0x35   :  { %96 = dma.done.wait [#allocation4], 64  }
  0x36   :  { %97 = vsyncadd [#allocation4], 4294967232 }
  0x37   :  { %46 = vsyncpa [#allocation3], 1 }
  0x38   :  { %47 = vsyncpa [#allocation4], 1 }

</bundles_post_ra>
